<compile_context>
chip_gen: v5e
topology: v5e:2x2
jax: 0.10.0
libtpu: 0.0.40
codegen_flags: <defaults>
</compile_context>

<pallas_src>
import functools

import jax
import jax.numpy as jnp
from jax.experimental import pallas as pl
from jax.experimental.pallas import tpu as pltpu


def maxstate_kernel(x_ref, w_ref, o_ref, m_ref, *, seq_len, hidden, head_size):
    """Processes one batch element per grid step.

    x_ref: [s, hidden]        (batch dim squeezed away by the BlockSpec)
    w_ref: [hidden, n_fused]  fused [W0.T | W1.T | W2.T | zero-pad] weights
    o_ref: [s, hidden]        output block
    m_ref: [s, hidden] f32    VMEM scratch holding the running cummax
    """
    x = x_ref[...]                                          # [s, hidden]

    # One fused MXU matmul for all three head projections (one push/pop
    # instead of three K=32/N=32 matmuls).
    abc = jnp.dot(x, w_ref[...], preferred_element_type=jnp.float32)
    a = abc[:, 0 * hidden:1 * hidden]                       # head0(x)
    b1 = abc[:, 1 * hidden:2 * hidden]                      # head1(x)
    c = abc[:, 2 * hidden:3 * hidden]                       # head2(x)

    scale = 1.0 / (head_size ** 0.5)
    m_ref[...] = (a + b1) * scale

    # Log-depth (Hillis-Steele) cumulative max along the sequence axis:
    # ceil(log2(seq_len)) vectorized steps instead of a serial chain of
    # seq_len (1, hidden) maxima.  Each step reads both slices (old values)
    # before writing, so the in-place update is a correct inclusive scan.
    shift = 1
    while shift < seq_len:
        prev = m_ref[: seq_len - shift, :]
        cur = m_ref[shift:, :]
        m_ref[shift:, :] = jnp.maximum(cur, prev)
        shift *= 2

    m = m_ref[...]
    # Fused epilogue, single bulk store.
    o_ref[...] = ((m + c) * m + b1).astype(o_ref.dtype)


def max_state_forward(x, w0, w1, w2, heads):
    """x: [b, s, hidden]; w0/w1/w2: [hidden, hidden] PyTorch-style [out, in]."""
    b, s, hidden = x.shape
    assert hidden % heads == 0
    head_size = hidden // heads

    # Fuse the three projection weights into a single [hidden_in, 3*hidden_out]
    # operand (x @ Wcat == [x@W0.T | x@W1.T | x@W2.T]); zero-pad the lane axis
    # to a multiple of 128 so the MXU result path is lane-dense.
    w_cat = jnp.concatenate(
        [w0.T.astype(x.dtype), w1.T.astype(x.dtype), w2.T.astype(x.dtype)], axis=1
    )                                                        # [hidden, 3*hidden]
    n_pad = (-w_cat.shape[1]) % 128
    if n_pad:
        w_cat = jnp.pad(w_cat, ((0, 0), (0, n_pad)))
    n_fused = w_cat.shape[1]

    kernel = functools.partial(
        maxstate_kernel, seq_len=s, hidden=hidden, head_size=head_size
    )
    # grid=(b,): one batch element per step; with batch=2 both v7x TensorCores
    # get work.  The full sequence lives in one block (the cummax carry stays
    # inside the kernel); for very large seq one would tile seq with an
    # "arbitrary" axis and carry the running max in VMEM scratch instead.
    out = pl.pallas_call(
        kernel,
        out_shape=jax.ShapeDtypeStruct((b, s, hidden), x.dtype),
        grid=(b,),
        in_specs=[
            pl.BlockSpec((None, s, hidden), lambda i: (i, 0, 0)),
            pl.BlockSpec((hidden, n_fused), lambda i: (0, 0)),
        ],
        out_specs=pl.BlockSpec((None, s, hidden), lambda i: (i, 0, 0)),
        scratch_shapes=[pltpu.VMEM((s, hidden), jnp.float32)],
        compiler_params=pltpu.CompilerParams(dimension_semantics=("parallel",)),
    )(x, w_cat)
    return out, None  # (out, state) like the PyTorch module


def max_state_reference(x, w0, w1, w2, heads):
    """Pure-JAX reference mirroring the PyTorch forward exactly."""
    b, s, hidden = x.shape
    k = heads
    h = hidden // heads
    out = x @ w0.T
    out1 = x @ w1.T
    out2 = x @ w2.T
    out_p = jnp.transpose(out.reshape(b, s, k, h), (0, 2, 1, 3))
    out1_p = jnp.transpose(out1.reshape(b, s, k, h), (0, 2, 1, 3))
    cm = jax.lax.cummax((out_p + out1_p) / (h ** 0.5), axis=2)
    cm = jnp.transpose(cm, (0, 2, 1, 3)).reshape(b, s, hidden)
    out1_back = jnp.transpose(out1_p, (0, 2, 1, 3)).reshape(b, s, hidden)
    return (cm + out2) * cm + out1_back


if __name__ == "__main__":
    hidden_dim = 32
    heads = 4
    batch = 2
    seq = 8

    key = jax.random.PRNGKey(0)
    kx, k0, k1, k2 = jax.random.split(key, 4)
    x = jax.random.normal(kx, (batch, seq, hidden_dim), dtype=jnp.float32)
    # Deterministic synthetic weights (nn.Linear-style [out_features, in_features]).
    bound = 1.0 / (hidden_dim ** 0.5)
    w0 = jax.random.uniform(k0, (hidden_dim, hidden_dim), jnp.float32, -bound, bound)
    w1 = jax.random.uniform(k1, (hidden_dim, hidden_dim), jnp.float32, -bound, bound)
    w2 = jax.random.uniform(k2, (hidden_dim, hidden_dim), jnp.float32, -bound, bound)

    out, state = max_state_forward(x, w0, w1, w2, heads)
    out = jax.block_until_ready(out)

    ref = max_state_reference(x, w0, w1, w2, heads)
    if not jnp.allclose(out, ref, atol=1e-5, rtol=1e-5):
        raise AssertionError("Pallas kernel output does not match reference")

    print("KERNEL_OK")
</pallas_src>

<mosaic_0001>
module attributes {stable_mosaic.version = 11 : i64} {
  func.func @maxstate_kernel(%arg0: i32, %arg1: memref<1x8x32xf32, #tpu.memory_space<vmem>>, %arg2: memref<32x128xf32, #tpu.memory_space<vmem>>, %arg3: memref<1x8x32xf32, #tpu.memory_space<vmem>>, %arg4: memref<8x32xf32, #tpu.memory_space<vmem>>) attributes {dimension_semantics = [#tpu.dimension_semantics<parallel>], iteration_bounds = array<i64: 2>, scalar_prefetch = 0 : i64, scratch_operands = 1 : i64, tpu.core_type = #tpu.core_type<tc>, window_params = [{transform_indices = @transform_0, window_bounds = array<i64: 1, 8, 32>}, {pipeline_mode = #tpu.pipeline_mode<synchronous>, transform_indices = @transform_1, window_bounds = array<i64: 32, 128>}, {transform_indices = @transform_2, window_bounds = array<i64: 1, 8, 32>}]} {
    %c0 = arith.constant 0 : index
    %c0_0 = arith.constant 0 : index
    %c0_1 = arith.constant 0 : index
    %0 = vector.load %arg1[%c0, %c0_0, %c0_1] : memref<1x8x32xf32, #tpu.memory_space<vmem>>, vector<1x8x32xf32>
    %1 = vector.shape_cast %0 : vector<1x8x32xf32> to vector<8x32xf32>
    %c0_2 = arith.constant 0 : index
    %c0_3 = arith.constant 0 : index
    %2 = vector.load %arg2[%c0_2, %c0_3] : memref<32x128xf32, #tpu.memory_space<vmem>>, vector<32x128xf32>
    %cst = arith.constant dense<0.000000e+00> : vector<8x128xf32>
    %3 = tpu.matmul %1, %2, %cst {dimension_numbers = #tpu.dot_dimension_numbers<[1], [0], [0], [1], [0, 0, 1, 1], [], []>} : vector<8x32xf32>, vector<32x128xf32>, vector<8x128xf32> -> vector<8x128xf32>
    %4 = vector.extract_strided_slice %3 {offsets = [0, 0], sizes = [8, 32], strides = [1, 1]} : vector<8x128xf32> to vector<8x32xf32>
    %5 = vector.extract_strided_slice %3 {offsets = [0, 32], sizes = [8, 32], strides = [1, 1]} : vector<8x128xf32> to vector<8x32xf32>
    %6 = vector.extract_strided_slice %3 {offsets = [0, 64], sizes = [8, 32], strides = [1, 1]} : vector<8x128xf32> to vector<8x32xf32>
    %7 = arith.addf %4, %5 : vector<8x32xf32>
    %cst_4 = arith.constant 0.353553385 : f32
    %8 = vector.broadcast %cst_4 : f32 to vector<8x32xf32>
    %9 = arith.mulf %7, %8 : vector<8x32xf32>
    %c0_5 = arith.constant 0 : index
    %c0_6 = arith.constant 0 : index
    %10 = vector.load %arg4[%c0_5, %c0_6] : memref<8x32xf32, #tpu.memory_space<vmem>>, vector<8x32xf32>
    tpu.vector_store %arg4[%c0_5, %c0_6], %9 {strides = array<i32>} : memref<8x32xf32, #tpu.memory_space<vmem>>, vector<8x32xf32>,
    %c0_7 = arith.constant 0 : index
    %c0_8 = arith.constant 0 : index
    %11 = vector.load %arg4[%c0_7, %c0_8] : memref<8x32xf32, #tpu.memory_space<vmem>>, vector<7x32xf32>
    %c1 = arith.constant 1 : index
    %c0_9 = arith.constant 0 : index
    %12 = vector.load %arg4[%c1, %c0_9] : memref<8x32xf32, #tpu.memory_space<vmem>>, vector<7x32xf32>
    %13 = arith.maximumf %12, %11 : vector<7x32xf32>
    %c1_10 = arith.constant 1 : index
    %c0_11 = arith.constant 0 : index
    %14 = vector.load %arg4[%c1_10, %c0_11] : memref<8x32xf32, #tpu.memory_space<vmem>>, vector<7x32xf32>
    tpu.vector_store %arg4[%c1_10, %c0_11], %13 {strides = array<i32>} : memref<8x32xf32, #tpu.memory_space<vmem>>, vector<7x32xf32>,
    %c0_12 = arith.constant 0 : index
    %c0_13 = arith.constant 0 : index
    %15 = vector.load %arg4[%c0_12, %c0_13] : memref<8x32xf32, #tpu.memory_space<vmem>>, vector<6x32xf32>
    %c2 = arith.constant 2 : index
    %c0_14 = arith.constant 0 : index
    %16 = vector.load %arg4[%c2, %c0_14] : memref<8x32xf32, #tpu.memory_space<vmem>>, vector<6x32xf32>
    %17 = arith.maximumf %16, %15 : vector<6x32xf32>
    %c2_15 = arith.constant 2 : index
    %c0_16 = arith.constant 0 : index
    %18 = vector.load %arg4[%c2_15, %c0_16] : memref<8x32xf32, #tpu.memory_space<vmem>>, vector<6x32xf32>
    tpu.vector_store %arg4[%c2_15, %c0_16], %17 {strides = array<i32>} : memref<8x32xf32, #tpu.memory_space<vmem>>, vector<6x32xf32>,
    %c0_17 = arith.constant 0 : index
    %c0_18 = arith.constant 0 : index
    %19 = vector.load %arg4[%c0_17, %c0_18] : memref<8x32xf32, #tpu.memory_space<vmem>>, vector<4x32xf32>
    %c4 = arith.constant 4 : index
    %c0_19 = arith.constant 0 : index
    %20 = vector.load %arg4[%c4, %c0_19] : memref<8x32xf32, #tpu.memory_space<vmem>>, vector<4x32xf32>
    %21 = arith.maximumf %20, %19 : vector<4x32xf32>
    %c4_20 = arith.constant 4 : index
    %c0_21 = arith.constant 0 : index
    %22 = vector.load %arg4[%c4_20, %c0_21] : memref<8x32xf32, #tpu.memory_space<vmem>>, vector<4x32xf32>
    tpu.vector_store %arg4[%c4_20, %c0_21], %21 {strides = array<i32>} : memref<8x32xf32, #tpu.memory_space<vmem>>, vector<4x32xf32>,
    %c0_22 = arith.constant 0 : index
    %c0_23 = arith.constant 0 : index
    %23 = vector.load %arg4[%c0_22, %c0_23] : memref<8x32xf32, #tpu.memory_space<vmem>>, vector<8x32xf32>
    %24 = arith.addf %23, %6 : vector<8x32xf32>
    %25 = arith.mulf %24, %23 : vector<8x32xf32>
    %26 = arith.addf %25, %5 : vector<8x32xf32>
    %c0_24 = arith.constant 0 : index
    %c0_25 = arith.constant 0 : index
    %c0_26 = arith.constant 0 : index
    %27 = vector.load %arg3[%c0_24, %c0_25, %c0_26] : memref<1x8x32xf32, #tpu.memory_space<vmem>>, vector<1x8x32xf32>
    %28 = vector.shape_cast %27 : vector<1x8x32xf32> to vector<8x32xf32>
    %29 = vector.shape_cast %26 : vector<8x32xf32> to vector<1x8x32xf32>
    tpu.vector_store %arg3[%c0_24, %c0_25, %c0_26], %29 {strides = array<i32>} : memref<1x8x32xf32, #tpu.memory_space<vmem>>, vector<1x8x32xf32>,
    return
  }
  func.func @transform_0(%arg0: i32) -> (i32, i32, i32) {
    %c0_i32 = arith.constant 0 : i32
    %c0_i32_0 = arith.constant 0 : i32
    %c0_i32_1 = arith.constant 0 : i32
    return %arg0, %c0_i32, %c0_i32_0 : i32, i32, i32
  }
  func.func @transform_1(%arg0: i32) -> (i32, i32) {
    %c0_i32 = arith.constant 0 : i32
    %c0_i32_0 = arith.constant 0 : i32
    %c0_i32_1 = arith.constant 0 : i32
    return %c0_i32, %c0_i32_0 : i32, i32
  }
  func.func @transform_2(%arg0: i32) -> (i32, i32, i32) {
    %c0_i32 = arith.constant 0 : i32
    %c0_i32_0 = arith.constant 0 : i32
    %c0_i32_1 = arith.constant 0 : i32
    return %arg0, %c0_i32, %c0_i32_0 : i32, i32, i32
  }
}

</mosaic_0001>

<bundles_post_ra>
// kernel: tpu_custom_call.1
= control target key start
LH: loop header
LB: loop body
LE: loop exit
PB: predicated region body
PF: predicated region fallthrough
CT: control target
= control target key end

     0   :  { %7 = vsyncpa [#allocation4], 0  ;;  %s704_s0 = inlined_call_operand.hbm [shape: f32[2,8,32], index: 0, kind: input, shape index: {}]   ;;  %s705_s1 = inlined_call_operand.hbm [shape: f32[32,128], index: 1, kind: input, shape index: {}]   ;;  %s706_s2 = inlined_call_operand.hbm [shape: f32[2,8,32], index: 2, kind: output, shape index: {}]  }
   0x1   :  { %9 = vsyncpa [#allocation4 + $0x1], 0 }
   0x2   :  { %10 = vsyncpa [#allocation7], 0 }
   0x3   :  { %11 = vsyncpa [#allocation5], 0 }
   0x4   :  { %13 = vsyncpa [#allocation5 + $0x1], 0  ;;  %s561_s9 = smov 0   ;;  %s563_s10 = smov 0  }
   0x5   :  { %s565_s11 = smov 0   ;;  %s567_s12 = smov 0  }
   0x6 LB: > { %s108_s15 = sshll.u32 %s705_s1, 4  ;;  %s585_s16 = sadd.s32 4294967295, %s539_s12   ;;  %s539_s12 = sphi %s567_s12, %s716_s12   ;;  %s535_s11 = sphi %s565_s11, %s715_s11   ;;  %s531_s10 = sphi %s563_s10, %s714_s10   ;;  %s527_s9 = sphi %s561_s9, %s713_s9   ;;  %s109_s15 = int_to_ptr.hbm [resolvable:$true] %s108_s15 }
   0x7   : > { %p334_p0 = scmp.ge.s32.totalorder %s539_s12, 1  ;;  %p40_p1 = scmp.eq.s32.totalorder %s585_s16, 0 }
   0x8   : > { %p97_p2 = scmp.lt.s32.totalorder %s539_s12, 3  ;;  %s541_s18 = smov [#allocation6]  }
   0x9   : > { %s110_s19 = sshll.u32 %s541_s18, 4  ;;  %s542_s20 = smov 128   ;;  %s111_s19 = int_to_ptr.vmem [resolvable:$true] %s110_s19 }
   0xa   : > { %p590_p3 = pnand %p334_p0, %p97_p2  ;;  %s543_s21 = smov 8  }
   0xb   : > { %s333_s22 = sadd.s32 4294967294, %s539_s12   ;;  %s601_s23 = sadd.s32 1, %s539_s12  }
   0xc   : > { %p356_p4 = pneg %p590_p3  ;;  %s26_s24 = sadd.s32 1, %s535_s11 }
   0xd   : > { %s23_s25 = ssub.s32 %s539_s12, %s601_s23  ;;  %p33_p7 = scmp.ne.s32.totalorder %s535_s11, %s531_s10 }
   0xe   : > { %p357_p6 = pnand %p356_p4, %p40_p1  ;;  %p24_p8 = scmp.eq.s32.totalorder %s23_s25, 0 }
   0xf   : > { %p34_p9 = scmp.eq.s32.totalorder %s539_s12, 0  ;;  %p39_p10 = scmp.ne.s32.totalorder %s531_s10, %s527_s9 }
  0x10   : > { %359 = dma.hbm_to_vmem [thread:$0]  (!%p357_p6), %s109_s15, 512, %s111_s19, [#allocation7], %s542_s20, %s542_s20, %s543_s21  }
  0x11   : > { %p84_p11 = scmp.eq.s32.totalorder %s585_s16, 1  ;;  %p617_p12 = por %p40_p1, %p39_p10 }
  0x12   : > { %s613_s26 = scalar_select %p24_p8, %s535_s11, %s26_s24  }
  0x13   : > { %p621_p13 = por %p84_p11, %p33_p7  ;;  %p90_p0 = scmp.eq.s32.totalorder %s333_s22, 1 }
  0x14   : > { %p35_p2 = por %p34_p9, %p33_p7  ;;  %s124_s29 = sand.u32 1, %s535_s11  }
  0x15   : > { %p626_p4 = por %p90_p0, %p39_p10  ;;  %p369_p6 = scmp.lt.s32.totalorder %s539_s12, 2 }
  0x16   : > { %s337_s3 = sshll.u32 %s124_s29, 3  ;;  %s338_s4 = sshll.u32 %s539_s12, 3 }
  0x17   : > { %s132_s7 = scalar_lea.hbm %s704_s0, %s338_s4  ;;  %s128_s13 = scalar_lea.vmem [#allocation3], %s337_s3 }
  0x18   : > { %s134_s8 = sshll.u32 %s132_s7, 4  ;;  %s136_s14 = sshll.u32 %s128_s13, 4  ;;  %s135_s8 = int_to_ptr.hbm [resolvable:$true] %s134_s8  ;;  %s137_s14 = int_to_ptr.vmem [resolvable:$true] %s136_s14 }
  0x19   : > { %p635_p8 = pnand %p369_p6, %p35_p2  ;;  %s125_s18 = scalar_lea.sflag [#allocation4], %s124_s29 }
  0x1a   : > { %s439_s19 = sshra.s32 %s135_s8, 4  ;;  %s446_s24 = scalar_lea.hbm %s704_s0, 16  ;;  %s440_s19 = int_to_ptr.hbm [resolvable:$true] %s439_s19 }
  0x1b   : > { %s441_s20 = scalar_lea.hbm %s440_s19, 8  ;;  %p443_p9 = pneg %p635_p8 }
  0x1c   : > { %p442_p7 = scmp.ne.s32.totalorder %s440_s19, %s441_s20  ;;  %p447_p0 = scmp.lt.s32.totalorder %s440_s19, %s704_s0 }
  0x1d   : > { %p448_p2 = scmp.lt.s32.totalorder %s446_s24, %s441_s20 }
  0x1e   : > { %p444_p10 = pnand %p443_p9, %p442_p7 }
  0x1f   : > { %p449_p6 = por %p448_p2, %p447_p0 }
  0x20   : > { %p445_p11 = pneg %p444_p10 }
  0x22   : > { %p450_p5 = pnand %p449_p6, %p445_p11 }
  0x24   : > { %453 = shalt.err (!%p450_p5)
}
  0x25   : > { %363 = dma.hbm_to_vmem [thread:$0]  (!%p635_p8), %s135_s8, 128, %s137_s14, %s125_s18  }
  0x26   : > { %145 = sbr.rel (%p590_p3) target bundleno = 348 (0x15c), region = 28  ;;  %s652_s29 = sand.u32 (!%p590_p3), 1, %s531_s10  }
  0x27   : > { %s340_s4 = sshll.u32 (!%p590_p3), %s652_s29, 3  ;;  %s148_s5 = scalar_lea.sflag (!%p590_p3), [#allocation4], %s652_s29 }
  0x28   : > { %s151_s6 = scalar_lea.vmem (!%p590_p3), [#allocation3], %s340_s4 }
  0x2b   : > { %514 = dma.done.wait (%p617_p12), %s148_s5, 128  }
  0x2c   : > { %516 = vsyncadd (%p617_p12), %s148_s5, 4294967168 }
  0x2d   : > { %518 = dma.done.wait (%p40_p1), [#allocation7], 512  }
  0x2e   : > { %520 = vsyncadd (%p40_p1), [#allocation7], 4294966784  ;;  %v182_v0 = vld [vmem:[#allocation6 + $0x18] sm:$0xff]  ;;  %v181_v1 = vld [vmem:[#allocation6 + $0x10] sm:$0xff]  ;;  %vm183_vm0 = vcmask 261120   ;;  %s544_s17 = smov 96  }
  0x2f   : > { %199 = vmatpush.msra.mxu0 %v182_v0  ;;  %v180_v2 = vld [vmem:[#allocation6 + $0x8] sm:$0xff]  ;;  %v179_v3 = vld [vmem:[#allocation6] sm:$0xff]  ;;  %v178_v4 = vld [vmem:[%s151_s6] sm:$0xff]  ;;  %s545_s27 = smov 64   ;;  %vm217_vm1 = vcmask 260096   ;;  %vm222_vm2 = vcmask 259072  }
  0x30   : > { %vm227_vm3 = vcmask 257024   ;;  %s345_s7 = sshll.u32 %s585_s16, 3  ;;  %s177_s15 = scalar_lea.vmem [#allocation8], %s340_s4 }
  0x31   : > { %200 = vmatpush.msra.mxu0 %v181_v1  ;;  %s248_s14 = scalar_lea.hbm %s706_s2, %s345_s7  ;;  %s250_s18 = sshll.u32 %s177_s15, 4  ;;  %s251_s18 = int_to_ptr.vmem [resolvable:$true] %s250_s18 }
  0x32   : > { %s252_s19 = sshll.u32 %s248_s14, 4  ;;  %s238_s20 = scalar_lea.sflag [#allocation5], %s652_s29  ;;  %s253_s19 = int_to_ptr.hbm [resolvable:$true] %s252_s19 }
  0x33   : > { %201 = vmatpush.msra.mxu0 %v180_v2  ;;  %s483_s16 = sshra.s32 %s253_s19, 4  ;;  %s489_s25 = scalar_lea.hbm %s706_s2, 16  ;;  %s484_s16 = int_to_ptr.hbm [resolvable:$true] %s483_s16 }
  0x34   : > { %s485_s21 = scalar_lea.hbm %s484_s16, 8  ;;  %p490_p12 = scmp.lt.s32.totalorder %s484_s16, %s706_s2 }
  0x35   : > { %202 = vmatpush.msra.mxu0 %v179_v3  ;;  %p486_p1 = scmp.ne.s32.totalorder %s484_s16, %s485_s21  ;;  %p491_p8 = scmp.lt.s32.totalorder %s489_s25, %s485_s21 }
  0x36   : > { %343 = vmatmul.msk.f32.vlgmr.msra.gmra.mxu0 %vm183_vm0, %v178_v4 }
  0x37   : > { %p487_p3 = pnand %p486_p1, %p621_p13  ;;  %p492_p7 = por %p491_p8, %p490_p12 }
  0x39   : > { %p488_p5 = pneg %p487_p3 }
  0x3b   : > { %p493_p9 = pnand %p492_p7, %p488_p5 }
  0xb3   : > { %v204_v5 = vpop.f32.mrf.mxu0 }
  0xb4   : > { %208 = vrot.lane.b32.xlu0 %v204_v5, %s544_s17 }
  0xbc   : > { %230 = vrot.lane.b32.xlu0 %v204_v5, %s545_s27 }
 0x126   : > { %v209_v6 = vpop.permute.xlu0 %208 }
 0x127   : > { %v211_v7 = vadd.f32 %v209_v6, %v204_v5 }
 0x129   : > { %v212_v8 = vmul.f32 0.35355338, %v211_v7 }
 0x12b   : > { %213 = vst.msk [vmem:[#allocation2] sm:$0xff] %vm183_vm0, %v212_v8 }
 0x12e   : > { %v231_v19 = vpop.permute.xlu0 %230 }
 0x132   : > { %v214_v9 = vld [vmem:[#allocation2] sm:$0x7f] }
 0x133   : > { %v215_v10 = vld [vmem:[#allocation2 + $0x1] sm:$0x7f] }
 0x134   : > { %v216_v11 = vmax.f32 %v215_v10, %v214_v9 }
 0x136   : > { %218 = vst.msk [vmem:[#allocation2 + $0x1] sm:$0x7f] %vm217_vm1, %v216_v11 }
 0x13d   : > { %v219_v12 = vld [vmem:[#allocation2] sm:$0x3f] }
 0x13e   : > { %v220_v13 = vld [vmem:[#allocation2 + $0x2] sm:$0x3f] }
 0x13f   : > { %v221_v14 = vmax.f32 %v220_v13, %v219_v12 }
 0x141   : > { %223 = vst.msk [vmem:[#allocation2 + $0x2] sm:$0x3f] %vm222_vm2, %v221_v14 }
 0x148   : > { %v224_v15 = vld [vmem:[#allocation2] sm:$0xf]  ;;  %v225_v16 = vld [vmem:[#allocation2 + $0x4] sm:$0xf] }
 0x149   : > { %v226_v17 = vmax.f32 %v225_v16, %v224_v15 }
 0x14b   : > { %228 = vst.msk [vmem:[#allocation2 + $0x4] sm:$0xf] %vm227_vm3, %v226_v17 }
 0x152   : > { %v229_v18 = vld [vmem:[#allocation2] sm:$0xff] }
 0x153   : > { %v233_v20 = vadd.f32 %v231_v19, %v229_v18 }
 0x155   : > { %v234_v21 = vmul.f32 %v233_v20, %v229_v18 }
 0x157   : > { %v235_v22 = vadd.f32 %v234_v21, %v209_v6 }
 0x159   : > { %236 = vst.msk [vmem:[%s177_s15] sm:$0xff] %vm183_vm0, %v235_v22 }
 0x15a   : > { %496 = shalt.err (!%p493_p9)
}
 0x15b   : > { %354 = dma.vmem_to_hbm [thread:$0]  (%p621_p13), %s251_s18, 128, %s253_s19, %s238_s20  }
 0x15c PF: > { %s264_s29 = sand.u32 1, %s527_s9   ;;  %p712_p10 = scmp.ge.s32.totalorder %s539_s12, 2 }
 0x15d   : > { %s265_s5 = scalar_lea.sflag [#allocation5], %s264_s29 }
 0x15e   : > { %p365_p11 = pnand %p712_p10, %p626_p4 }
 0x160   : > { %p366_p0 = pneg %p365_p11 }
 0x162   : > { %522 = dma.done.wait (%p366_p0), %s265_s5, 128  }
 0x163   : > { %524 = vsyncadd (%p366_p0), %s265_s5, 4294967168  ;;  %p16_p2 = scmp.ge.s32.totalorder %s601_s23, 4   ;;  %s713_s9 = smov %s531_s10 }
 0x164   : > { %s714_s10 = smov %s535_s11  ;;  %s715_s11 = smov %s613_s26 }
 0x165   : > { %s716_s12 = smov %s601_s23  ;;  %18 = sbr.rel (!%p16_p2) target bundleno = 6 (0x6), region = 77 }
 0x16a   :  { %271 = vsyncpa [#allocation4], 1 }
 0x16b   :  { %273 = vsyncpa [#allocation4 + $0x1], 1 }
 0x16c   :  { %274 = vsyncpa [#allocation7], 1 }
 0x16d   :  { %275 = vsyncpa [#allocation5], 1 }
 0x16e   :  { %277 = vsyncpa [#allocation5 + $0x1], 1 }

</bundles_post_ra>
